<compile_context>
chip_gen: v5e
topology: v5e:2x2
jax: 0.10.0
libtpu: 0.0.40
codegen_flags: <defaults>
</compile_context>

<pallas_src>
import jax
import jax.numpy as jnp
from jax.experimental import pallas as pl
from jax.experimental.pallas import tpu as pltpu


def encoder_kernel(x_ref, mask_ref, w_ref, b_ref, gamma_ref, beta_ref, out_ref):
    # ---- Dropout (p = 0.5, training mode): mask in {0,1}, kept values * 2 ----
    x = x_ref[...] * mask_ref[...] * 2.0

    # ---- Linear: x @ W + b  (bf16 MXU inputs, f32 accumulation) --------------
    h = jnp.dot(
        x.astype(jnp.bfloat16),
        w_ref[...].astype(jnp.bfloat16),
        preferred_element_type=jnp.float32,
    ) + b_ref[...]

    # ---- ReLU ----------------------------------------------------------------
    h = jnp.maximum(h, 0.0)

    # ---- BatchNorm1d (training mode: biased batch statistics, eps=1e-5) ------
    n = h.shape[0]
    mean = jnp.sum(h, axis=0, keepdims=True) / n
    centered = h - mean
    var = jnp.sum(centered * centered, axis=0, keepdims=True) / n  # biased var
    inv_std = jax.lax.rsqrt(var + 1e-5)
    out_ref[...] = (gamma_ref[...] * centered * inv_std + beta_ref[...]).astype(
        out_ref.dtype
    )


def encoder_forward(x, w, b, gamma, beta, keep_mask, *, tile_h=128):
    """x, keep_mask: (N, dim_in) f32; w: (dim_in, H); b/gamma/beta: (1, H)."""
    n, d_in = x.shape
    h = w.shape[1]

    # Pad the hidden dimension up to a multiple of 128 for lane-dense stores.
    h_pad = ((h + tile_h - 1) // tile_h) * tile_h
    if h_pad != h:
        pad = h_pad - h
        w = jnp.pad(w, ((0, 0), (0, pad)))
        b = jnp.pad(b, ((0, 0), (0, pad)))
        gamma = jnp.pad(gamma, ((0, 0), (0, pad)), constant_values=1.0)
        beta = jnp.pad(beta, ((0, 0), (0, pad)))

    grid = (h_pad // tile_h,)

    out = pl.pallas_call(
        encoder_kernel,
        out_shape=jax.ShapeDtypeStruct((n, h_pad), jnp.float32),
        grid=grid,
        in_specs=[
            pl.BlockSpec((n, d_in), lambda j: (0, 0)),        # x (resident)
            pl.BlockSpec((n, d_in), lambda j: (0, 0)),        # dropout keep mask
            pl.BlockSpec((d_in, tile_h), lambda j: (0, j)),   # W tile
            pl.BlockSpec((1, tile_h), lambda j: (0, j)),      # bias tile
            pl.BlockSpec((1, tile_h), lambda j: (0, j)),      # gamma tile
            pl.BlockSpec((1, tile_h), lambda j: (0, j)),      # beta tile
        ],
        out_specs=pl.BlockSpec((n, tile_h), lambda j: (0, j)),
        compiler_params=pltpu.CompilerParams(
            dimension_semantics=("parallel",),
        ),
    )(x, keep_mask, w, b, gamma, beta)

    return out[:, :h]


if __name__ == "__main__":
    # Small shapes consistent with the module: batch=8, dim_in=32, dim_hidden=64
    N, DIM_IN, DIM_HIDDEN = 8, 32, 64

    key = jax.random.PRNGKey(0)
    kx, kw, kb, kd = jax.random.split(key, 4)

    x = jax.random.normal(kx, (N, DIM_IN), dtype=jnp.float32)

    # Deterministic parameter init (mimics nn.Linear's uniform fan-in init range).
    bound = 1.0 / (DIM_IN ** 0.5)
    w = jax.random.uniform(kw, (DIM_IN, DIM_HIDDEN), jnp.float32, -bound, bound)
    b = jax.random.uniform(kb, (1, DIM_HIDDEN), jnp.float32, -bound, bound)
    gamma = jnp.ones((1, DIM_HIDDEN), dtype=jnp.float32)   # BatchNorm1d weight
    beta = jnp.zeros((1, DIM_HIDDEN), dtype=jnp.float32)   # BatchNorm1d bias

    # Dropout keep mask (p_drop = 0.5) generated outside the kernel.
    keep_mask = jax.random.bernoulli(kd, 0.5, (N, DIM_IN)).astype(jnp.float32)

    out = encoder_forward(x, w, b, gamma, beta, keep_mask)
    jax.block_until_ready(out)

    assert out.shape == (N, DIM_HIDDEN)
    assert jnp.all(jnp.isfinite(out))
    print("KERNEL_OK")
</pallas_src>

<mosaic_0001>
module attributes {stable_mosaic.version = 11 : i64} {
  func.func @encoder_kernel(%arg0: i32, %arg1: memref<8x32xf32, #tpu.memory_space<vmem>>, %arg2: memref<8x32xf32, #tpu.memory_space<vmem>>, %arg3: memref<32x128xf32, #tpu.memory_space<vmem>>, %arg4: memref<1x128xf32, #tpu.memory_space<vmem>>, %arg5: memref<1x128xf32, #tpu.memory_space<vmem>>, %arg6: memref<1x128xf32, #tpu.memory_space<vmem>>, %arg7: memref<8x128xf32, #tpu.memory_space<vmem>>) attributes {dimension_semantics = [#tpu.dimension_semantics<parallel>], iteration_bounds = array<i64: 1>, scalar_prefetch = 0 : i64, scratch_operands = 0 : i64, tpu.core_type = #tpu.core_type<tc>, window_params = [{pipeline_mode = #tpu.pipeline_mode<synchronous>, transform_indices = @transform_0, window_bounds = array<i64: 8, 32>}, {pipeline_mode = #tpu.pipeline_mode<synchronous>, transform_indices = @transform_1, window_bounds = array<i64: 8, 32>}, {transform_indices = @transform_2, window_bounds = array<i64: 32, 128>}, {transform_indices = @transform_3, window_bounds = array<i64: 1, 128>}, {transform_indices = @transform_4, window_bounds = array<i64: 1, 128>}, {transform_indices = @transform_5, window_bounds = array<i64: 1, 128>}, {transform_indices = @transform_6, window_bounds = array<i64: 8, 128>}]} {
    %c0 = arith.constant 0 : index
    %c0_0 = arith.constant 0 : index
    %0 = vector.load %arg1[%c0, %c0_0] : memref<8x32xf32, #tpu.memory_space<vmem>>, vector<8x32xf32>
    %c0_1 = arith.constant 0 : index
    %c0_2 = arith.constant 0 : index
    %1 = vector.load %arg2[%c0_1, %c0_2] : memref<8x32xf32, #tpu.memory_space<vmem>>, vector<8x32xf32>
    %2 = arith.mulf %0, %1 : vector<8x32xf32>
    %cst = arith.constant 2.000000e+00 : f32
    %3 = vector.broadcast %cst : f32 to vector<8x32xf32>
    %4 = arith.mulf %2, %3 : vector<8x32xf32>
    %5 = arith.truncf %4 : vector<8x32xf32> to vector<8x32xbf16>
    %c0_3 = arith.constant 0 : index
    %c0_4 = arith.constant 0 : index
    %6 = vector.load %arg3[%c0_3, %c0_4] : memref<32x128xf32, #tpu.memory_space<vmem>>, vector<32x128xf32>
    %7 = arith.truncf %6 : vector<32x128xf32> to vector<32x128xbf16>
    %cst_5 = arith.constant dense<0.000000e+00> : vector<8x128xf32>
    %8 = tpu.matmul %5, %7, %cst_5 {dimension_numbers = #tpu.dot_dimension_numbers<[1], [0], [0], [1], [0, 0, 1, 1], [], []>} : vector<8x32xbf16>, vector<32x128xbf16>, vector<8x128xf32> -> vector<8x128xf32>
    %c0_6 = arith.constant 0 : index
    %c0_7 = arith.constant 0 : index
    %9 = vector.load %arg4[%c0_6, %c0_7] : memref<1x128xf32, #tpu.memory_space<vmem>>, vector<1x128xf32>
    %10 = vector.broadcast %9 : vector<1x128xf32> to vector<8x128xf32>
    %11 = arith.addf %8, %10 : vector<8x128xf32>
    %cst_8 = arith.constant 0.000000e+00 : f32
    %12 = vector.broadcast %cst_8 : f32 to vector<8x128xf32>
    %13 = arith.maximumf %11, %12 : vector<8x128xf32>
    %cst_9 = arith.constant dense<0.000000e+00> : vector<128xf32>
    %14 = vector.multi_reduction <add>, %13, %cst_9 [0] : vector<8x128xf32> to vector<128xf32>
    %15 = vector.shape_cast %14 : vector<128xf32> to vector<1x128xf32>
    %cst_10 = arith.constant 8.000000e+00 : f32
    %16 = vector.broadcast %cst_10 : f32 to vector<1x128xf32>
    %17 = arith.divf %15, %16 : vector<1x128xf32>
    %18 = vector.broadcast %17 : vector<1x128xf32> to vector<8x128xf32>
    %19 = arith.subf %13, %18 : vector<8x128xf32>
    %20 = arith.mulf %19, %19 : vector<8x128xf32>
    %cst_11 = arith.constant dense<0.000000e+00> : vector<128xf32>
    %21 = vector.multi_reduction <add>, %20, %cst_11 [0] : vector<8x128xf32> to vector<128xf32>
    %22 = vector.shape_cast %21 : vector<128xf32> to vector<1x128xf32>
    %cst_12 = arith.constant 8.000000e+00 : f32
    %23 = vector.broadcast %cst_12 : f32 to vector<1x128xf32>
    %24 = arith.divf %22, %23 : vector<1x128xf32>
    %cst_13 = arith.constant 9.99999974E-6 : f32
    %25 = vector.broadcast %cst_13 : f32 to vector<1x128xf32>
    %26 = arith.addf %24, %25 : vector<1x128xf32>
    %27 = math.rsqrt %26 : vector<1x128xf32>
    %c0_14 = arith.constant 0 : index
    %c0_15 = arith.constant 0 : index
    %28 = vector.load %arg5[%c0_14, %c0_15] : memref<1x128xf32, #tpu.memory_space<vmem>>, vector<1x128xf32>
    %29 = vector.broadcast %28 : vector<1x128xf32> to vector<8x128xf32>
    %30 = arith.mulf %29, %19 : vector<8x128xf32>
    %31 = vector.broadcast %27 : vector<1x128xf32> to vector<8x128xf32>
    %32 = arith.mulf %30, %31 : vector<8x128xf32>
    %c0_16 = arith.constant 0 : index
    %c0_17 = arith.constant 0 : index
    %33 = vector.load %arg6[%c0_16, %c0_17] : memref<1x128xf32, #tpu.memory_space<vmem>>, vector<1x128xf32>
    %34 = vector.broadcast %33 : vector<1x128xf32> to vector<8x128xf32>
    %35 = arith.addf %32, %34 : vector<8x128xf32>
    %c0_18 = arith.constant 0 : index
    %c0_19 = arith.constant 0 : index
    %36 = vector.load %arg7[%c0_18, %c0_19] : memref<8x128xf32, #tpu.memory_space<vmem>>, vector<8x128xf32>
    tpu.vector_store %arg7[%c0_18, %c0_19], %35 {strides = array<i32>} : memref<8x128xf32, #tpu.memory_space<vmem>>, vector<8x128xf32>,
    return
  }
  func.func @transform_0(%arg0: i32) -> (i32, i32) {
    %c0_i32 = arith.constant 0 : i32
    %c0_i32_0 = arith.constant 0 : i32
    %c0_i32_1 = arith.constant 0 : i32
    return %c0_i32, %c0_i32_0 : i32, i32
  }
  func.func @transform_1(%arg0: i32) -> (i32, i32) {
    %c0_i32 = arith.constant 0 : i32
    %c0_i32_0 = arith.constant 0 : i32
    %c0_i32_1 = arith.constant 0 : i32
    return %c0_i32, %c0_i32_0 : i32, i32
  }
  func.func @transform_2(%arg0: i32) -> (i32, i32) {
    %c0_i32 = arith.constant 0 : i32
    %c0_i32_0 = arith.constant 0 : i32
    return %c0_i32, %arg0 : i32, i32
  }
  func.func @transform_3(%arg0: i32) -> (i32, i32) {
    %c0_i32 = arith.constant 0 : i32
    %c0_i32_0 = arith.constant 0 : i32
    return %c0_i32, %arg0 : i32, i32
  }
  func.func @transform_4(%arg0: i32) -> (i32, i32) {
    %c0_i32 = arith.constant 0 : i32
    %c0_i32_0 = arith.constant 0 : i32
    return %c0_i32, %arg0 : i32, i32
  }
  func.func @transform_5(%arg0: i32) -> (i32, i32) {
    %c0_i32 = arith.constant 0 : i32
    %c0_i32_0 = arith.constant 0 : i32
    return %c0_i32, %arg0 : i32, i32
  }
  func.func @transform_6(%arg0: i32) -> (i32, i32) {
    %c0_i32 = arith.constant 0 : i32
    %c0_i32_0 = arith.constant 0 : i32
    return %c0_i32, %arg0 : i32, i32
  }
}

</mosaic_0001>

<bundles_post_ra>
// kernel: tpu_custom_call.1
= control target key start
LH: loop header
LB: loop body
LE: loop exit
PB: predicated region body
PF: predicated region fallthrough
CT: control target
= control target key end

     0   :  { %11 = vsyncpa [#allocation3], 0  ;;  %s345_s0 = inlined_call_operand.hbm [shape: f32[8,32], index: 0, kind: input, shape index: {}]   ;;  %s346_s1 = inlined_call_operand.hbm [shape: f32[8,32], index: 1, kind: input, shape index: {}]   ;;  %s347_s2 = inlined_call_operand.hbm [shape: f32[32,128], index: 2, kind: input, shape index: {}]   ;;  %s348_s3 = inlined_call_operand.vmem [shape: f32[1,128], index: 3, kind: input, shape index: {}]   ;;  %s349_s4 = inlined_call_operand.vmem [shape: f32[1,128], index: 4, kind: input, shape index: {}]   ;;  %s350_s5 = inlined_call_operand.vmem [shape: f32[1,128], index: 5, kind: input, shape index: {}]   ;;  %s351_s6 = inlined_call_operand.hbm [shape: f32[8,128], index: 6, kind: output, shape index: {}]  }
   0x1   :  { %12 = vsyncpa [#allocation6], 0  ;;  %s30_s23 = sshll.u32 %s346_s1, 4  ;;  %s31_s23 = int_to_ptr.hbm [resolvable:$true] %s30_s23 }
   0x2   :  { %13 = vsyncpa [#allocation4], 0  ;;  %s282_s24 = smov [#allocation5]   ;;  %s19_s28 = sshll.u32 %s345_s0, 4  ;;  %s20_s28 = int_to_ptr.hbm [resolvable:$true] %s19_s28 }
   0x3   :  { %s32_s25 = sshll.u32 %s282_s24, 4  ;;  %s283_s29 = smov [#allocation2]   ;;  %s33_s25 = int_to_ptr.vmem [resolvable:$true] %s32_s25 }
   0x4   :  { %35 = dma.hbm_to_vmem [thread:$0]  %s31_s23, 128, %s33_s25, [#allocation6]  }
   0x5   :  { %s21_s30 = sshll.u32 %s283_s29, 4  ;;  %s40_s9 = sshll.u32 %s347_s2, 4  ;;  %s22_s30 = int_to_ptr.vmem [resolvable:$true] %s21_s30  ;;  %s41_s9 = int_to_ptr.hbm [resolvable:$true] %s40_s9 }
   0x6   :  { %24 = dma.hbm_to_vmem [thread:$0]  %s20_s28, 128, %s22_s30, [#allocation3]  }
   0x7   :  { %s284_s1 = smov [#allocation7]   ;;  %s285_s11 = smov 128  }
   0x8   :  { %s42_s10 = sshll.u32 %s284_s1, 4  ;;  %s286_s12 = smov 8   ;;  %s43_s10 = int_to_ptr.vmem [resolvable:$true] %s42_s10 }
   0x9   :  { %48 = dma.hbm_to_vmem [thread:$0]  %s41_s9, 512, %s43_s10, [#allocation6], %s285_s11, %s285_s11, %s286_s12  }
   0xa   :  { %276 = dma.done.wait [#allocation3], 128  }
   0xb   :  { %277 = vsyncadd [#allocation3], 4294967168 }
   0xc   :  { %278 = dma.done.wait [#allocation6], 640  }
   0xd   :  { %279 = vsyncadd [#allocation6], 4294966656  ;;  %v75_v0 = vld [vmem:[#allocation7 + $0x10] sm:$0xff]  ;;  %v76_v1 = vld [vmem:[#allocation7 + $0x18] sm:$0xff]  ;;  %vm83_vm0 = vcmask 261120   ;;  %v287_v11 = vmov 8.0  }
   0xe   :  { %v73_v2 = vld [vmem:[#allocation7] sm:$0xff]  ;;  %v78_v3 = vpack.c.bf16 %v76_v1, %v75_v0  ;;  %v74_v4 = vld [vmem:[#allocation7 + $0x8] sm:$0xff]  ;;  %v68_v5 = vld [vmem:[#allocation2] sm:$0xff]  ;;  %176 = vrcp.f32 %v287_v11  ;;  %s288_s16 = smov [#allocation8]   ;;  %s154_s20 = sshll.u32 %s351_s6, 4  ;;  %s155_s20 = int_to_ptr.hbm [resolvable:$true] %s154_s20 }
   0xf   :  { %v69_v6 = vld [vmem:[#allocation5] sm:$0xff]  ;;  %v77_v8 = vpack.c.bf16 %v74_v4, %v73_v2  ;;  %v173_v13 = vld [vmem:[%s348_s3] ss:$0 sm:$0xff]  ;;  %s152_s17 = sshll.u32 %s288_s16, 4  ;;  %s153_s17 = int_to_ptr.vmem [resolvable:$true] %s152_s17 }
  0x10   :  { %v70_v7 = vmul.f32 %v69_v6, %v68_v5  ;;  %93 = vmatpush.bf16.msra.mxu0 %v78_v3  ;;  %v174_v44 = vld [vmem:[%s349_s4] ss:$0 sm:$0xff] }
  0x11   :  { %v175_v48 = vld [vmem:[%s350_s5] ss:$0 sm:$0xff] }
  0x12   :  { %v71_v9 = vmul.f32 2.0, %v70_v7 }
  0x14   :  { %v72_v10 = vpack.c.bf16 %v71_v9, %v71_v9  ;;  %94 = vmatpush.bf16.msra.mxu0 %v77_v8  ;;  %v177_v12 = vpop.eup %176 }
  0x15   :  { %v108_v14 = vmul.f32 8.0, %v177_v12  ;;  %vm112_vm1 = vweird.f32 %v177_v12 }
  0x17   :  { %165 = vmatmul.msk.bf16.vlgmr.msra.gmra.mxu0 %vm83_vm0, %v72_v10  ;;  %v109_v17 = vsub.f32 1.0, %v108_v14 }
  0x19   :  { %v110_v20 = vmul.f32 %v177_v12, %v109_v17 }
  0x1b   :  { %v111_v24 = vadd.f32 %v177_v12, %v110_v20 }
  0x1d   :  { %v113_v27 = vsel %vm112_vm1, %v177_v12, %v111_v24 }
  0x94   :  { %v96_v15 = vpop.f32.mrf.mxu0 }
  0x95   :  { %v97_v16 = vadd.f32 %v173_v13, %v96_v15 }
  0x97   :  { %v100_v18 = vmax.f32 %v97_v16, 0.0 }
  0x99   :  { %v101_v19 = vrot.slane %v100_v18, 4 }
  0x9b   :  { %v102_v21 = vadd.f32 %v101_v19, %v100_v18 }
  0x9c   :  { %v98_v22 = vpop.f32.mrf.mxu0 }
  0x9d   :  { %v103_v23 = vrot.slane %v102_v21, 2 }
  0x9f   :  { %v104_v25 = vadd.f32 %v103_v23, %v102_v21 }
  0xa1   :  { %v105_v26 = vrot.slane %v104_v25, 1 }
  0xa3   :  { %v106_v28 = vadd.f32 %v105_v26, %v104_v25 }
  0xa5   :  { %v114_v29 = vmul.f32 %v113_v27, %v106_v28 }
  0xa7   :  { %v115_v30 = vsub.f32 %v100_v18, %v114_v29 }
  0xa9   :  { %v116_v31 = vmul.f32 %v115_v30, %v115_v30  ;;  %v139_v47 = vmul.f32 %v174_v44, %v115_v30 }
  0xab   :  { %v117_v32 = vrot.slane %v116_v31, 4 }
  0xad   :  { %v118_v33 = vadd.f32 %v117_v32, %v116_v31 }
  0xaf   :  { %v119_v34 = vrot.slane %v118_v33, 2 }
  0xb1   :  { %v120_v35 = vadd.f32 %v119_v34, %v118_v33 }
  0xb3   :  { %v121_v36 = vrot.slane %v120_v35, 1 }
  0xb5   :  { %v122_v37 = vadd.f32 %v121_v36, %v120_v35 }
  0xb7   :  { %v123_v38 = vmul.f32 %v122_v37, %v113_v27 }
  0xb9   :  { %v124_v39 = vadd.f32 1e-05, %v123_v38 }
  0xbb   :  { %178 = vrsqrt.f32 %v124_v39  ;;  %vm131_vm3 = vweird.f32 %v124_v39 }
  0xc1   :  { %v179_v40 = vpop.eup %178 }
  0xc2   :  { %v126_v41 = vmul.f32 %v179_v40, %v124_v39  ;;  %vm132_vm2 = vweird.f32 %v179_v40 }
  0xc3   :  { %vm133_vm4 = vmor %vm131_vm3, %vm132_vm2 }
  0xc4   :  { %v127_v42 = vmul.f32 %v179_v40, %v126_v41 }
  0xc6   :  { %v128_v43 = vmul.f32 0.5, %v127_v42 }
  0xc8   :  { %v129_v45 = vsub.f32 1.5, %v128_v43 }
  0xca   :  { %v130_v46 = vmul.f32 %v179_v40, %v129_v45 }
  0xcc   :  { %v134_v49 = vsel %vm133_vm4, %v179_v40, %v130_v46 }
  0xcd   :  { %v140_v50 = vmul.f32 %v139_v47, %v134_v49 }
  0xcf   :  { %v145_v51 = vadd.f32 %v175_v48, %v140_v50 }
  0xd1   :  { %146 = vst [vmem:[#allocation8] sm:$0xff] %v145_v51 }
  0xd2   :  { %157 = dma.vmem_to_hbm [thread:$0]  %s153_s17, 128, %s155_s20, [#allocation4]  }
  0xd3   :  { %280 = dma.done.wait [#allocation4], 128  }
  0xd4   :  { %281 = vsyncadd [#allocation4], 4294967168 }
  0xd5   :  { %162 = vsyncpa [#allocation3], 1 }
  0xd6   :  { %163 = vsyncpa [#allocation6], 1 }
  0xd7   :  { %164 = vsyncpa [#allocation4], 1 }

</bundles_post_ra>
